<compile_context>
chip_gen: v6e
topology: v6e:2x2x1
jax: 0.10.0
libtpu: 0.0.40
codegen_flags: <defaults>
</compile_context>

<pallas_src>
import functools
import math

import jax
import jax.numpy as jnp
from jax.experimental import pallas as pl
from jax.experimental.pallas import tpu as pltpu


def _round_up(x, m):
    return ((x + m - 1) // m) * m


def _pick_c_tile(C, cap):
    """Largest channel tile <= cap that divides C and keeps sublane alignment."""
    if C <= cap:
        return C
    for t in range(cap, 0, -1):
        if C % t == 0 and t % 8 == 0:
            return t
    return C  # no aligned divisor: single full-C tile (block == full dim is legal)


def _pick_row_tile(H, W, hw_tile_cap):
    """rows_per_tile with rows*W % 128 == 0 and rows*W <= cap (when possible)."""
    r_min = 128 // math.gcd(W, 128)          # smallest row count with rows*W % 128 == 0
    rows_budget = max(1, hw_tile_cap // W)
    rows = max(r_min, (rows_budget // r_min) * r_min)
    rows = min(rows, _round_up(H, r_min))    # don't over-pad tiny maps
    return rows


def _bev_gather_kernel(kxy_ref, fm_ref, out_ref, *acc_refs, H, W, rows_per_tile,
                       off_x, off_y, inv_sx, inv_sy, scale_ix, scale_iy,
                       compute_dtype):
    hw = pl.program_id(2)

    kxy = kxy_ref[0]                          # (2, K) f32
    kx = kxy[0:1, :]                          # (1, K)
    ky = kxy[1:2, :]                          # (1, K)

    # Fused coordinate math: clamp + Python-constant scales.  The module's flip and
    # "(dims - 1)" normalization collapse into the scales (W-1)/(H-2), (H-1)/(W-2).
    ix = jnp.clip((ky - off_y) * inv_sy, 0.0, H - 1.0) * scale_ix   # (1, K) along W
    iy = jnp.clip((kx - off_x) * inv_sx, 0.0, W - 1.0) * scale_iy   # (1, K) along H

    # Column tent weights, shared by every row of this tile: (W, K).
    col = jax.lax.broadcasted_iota(jnp.int32, (W, 1), 0).astype(jnp.float32)
    wx = jnp.maximum(0.0, 1.0 - jnp.abs(col - ix)).astype(compute_dtype)

    # Row tent weights for this tile's rows: (rows_per_tile, K).
    row = (jax.lax.broadcasted_iota(jnp.int32, (rows_per_tile, 1), 0)
           + hw * rows_per_tile).astype(jnp.float32)
    wy = jnp.maximum(0.0, 1.0 - jnp.abs(row - iy))
    # Rows >= H only exist in the zero-padded tail of fm; mask anyway so correctness
    # never depends on padding contents (== grid_sample padding_mode='zeros').
    wy = jnp.where(row < float(H), wy, 0.0).astype(compute_dtype)

    # Outer product -> (rows, W, K) -> (rows*W, K); relayout-free when W is
    # sublane-aligned (W % 8 == 0 for f32), and only touches VMEM either way.
    k = wx.shape[-1]
    w = (wy[:, None, :] * wx[None, :, :]).reshape(rows_per_tile * W, k)

    fm = fm_ref[0]                            # (c_tile, rows*W) in compute_dtype
    # (c_tile, K) += fm @ w, contracting the pixel axis on the MXU (f32 accumulate).
    partial = jax.lax.dot_general(
        fm, w, dimension_numbers=(((1,), (0,)), ((), ())),
        preferred_element_type=jnp.float32)

    if acc_refs:
        # Non-f32 output: f32 VMEM accumulator, cast once at the end.
        acc_ref = acc_refs[0]

        @pl.when(hw == 0)
        def _():
            acc_ref[...] = jnp.zeros_like(acc_ref)

        acc_ref[...] += partial

        @pl.when(hw == pl.num_programs(2) - 1)
        def _():
            out_ref[0] = acc_ref[...].astype(out_ref.dtype)
    else:
        # f32 output: accumulate directly into the VMEM-resident output block
        # (its index_map is constant over the hw axis) -- saves the scratch copy.
        @pl.when(hw == 0)
        def _():
            out_ref[...] = jnp.zeros_like(out_ref)

        out_ref[0] += partial


def bev_feature_gatherer(feature_map, keypoint_xyz, voxel_offset,
                         base_voxel_size, stride, *,
                         compute_dtype=jnp.bfloat16,
                         hw_tile_cap=4096, c_tile_cap=128,
                         vmem_limit_bytes=None):
    """feature_map: (N, C, H, W); keypoint_xyz: (N, K, 3)  ->  (N, C, K)."""
    N, C, H, W = feature_map.shape
    assert H > 2 and W > 2, "module normalizes by (dims - 1); needs H, W > 2"
    K0 = keypoint_xyz.shape[1]
    out_dtype = feature_map.dtype

    # Keypoint x/y packed lane-dense as (N, 2, K); pad K to a multiple of 128 so the
    # dot RHS and output stores stay lane-aligned (PV-RCNN's K=2048 already is).
    K = _round_up(K0, 128)
    kxy = jnp.transpose(keypoint_xyz[:, :, :2].astype(jnp.float32), (0, 2, 1))
    if K > K0:
        kxy = jnp.pad(kxy, ((0, 0), (0, 0), (0, K - K0)))

    # Whole-row pixel tiles (enables the wy x wx outer product in-kernel).
    rows_per_tile = _pick_row_tile(H, W, hw_tile_cap)
    H_pad = _round_up(H, rows_per_tile)
    hw_tile = rows_per_tile * W
    n_hw = H_pad // rows_per_tile

    # Free reshape of contiguous NCHW; zero-pad the row tail; cast to the MXU compute
    # dtype (bf16 halves fm DMA bytes; accumulation stays f32 inside the dot).
    fm = feature_map.reshape(N, C, H * W)
    if H_pad > H:
        fm = jnp.pad(fm, ((0, 0), (0, 0), (0, (H_pad - H) * W)))
    fm = fm.astype(compute_dtype)

    c_tile = _pick_c_tile(C, c_tile_cap)
    n_c = C // c_tile

    direct_acc = jnp.dtype(out_dtype) == jnp.dtype(jnp.float32)

    sx = float(base_voxel_size[0]) * float(stride)
    sy = float(base_voxel_size[1]) * float(stride)
    kernel = functools.partial(
        _bev_gather_kernel, H=H, W=W, rows_per_tile=rows_per_tile,
        off_x=float(voxel_offset[0]), off_y=float(voxel_offset[1]),
        inv_sx=1.0 / sx, inv_sy=1.0 / sy,
        scale_ix=(W - 1.0) / (H - 2.0),   # module divides by (dims - 1); H, W > 2
        scale_iy=(H - 1.0) / (W - 2.0),
        compute_dtype=compute_dtype)

    if vmem_limit_bytes is None:
        csz = jnp.dtype(compute_dtype).itemsize
        osz = jnp.dtype(out_dtype).itemsize
        est = (2 * c_tile * hw_tile * csz             # double-buffered fm blocks
               + 2 * c_tile * K * osz                 # double-buffered out blocks
               + (0 if direct_acc else c_tile * K * 4)
               + 2 * hw_tile * K * csz                # w outer product (+ reshape copy)
               + 2 * 2 * K * 4                        # kxy blocks
               + (4 << 20))                           # headroom
        vmem_limit_bytes = int(min(max(est, 32 << 20), 64 << 20))

    out = pl.pallas_call(
        kernel,
        out_shape=jax.ShapeDtypeStruct((N, C, K), out_dtype),
        grid=(N, n_c, n_hw),
        in_specs=[
            pl.BlockSpec((1, 2, K), lambda n, c, hw: (n, 0, 0)),
            pl.BlockSpec((1, c_tile, hw_tile), lambda n, c, hw: (n, c, hw)),
        ],
        out_specs=pl.BlockSpec((1, c_tile, K), lambda n, c, hw: (n, c, 0)),
        scratch_shapes=(() if direct_acc
                        else (pltpu.VMEM((c_tile, K), jnp.float32),)),
        compiler_params=pltpu.CompilerParams(
            dimension_semantics=("parallel", "parallel", "arbitrary"),
            vmem_limit_bytes=vmem_limit_bytes),
    )(kxy, fm)

    return out[:, :, :K0] if K > K0 else out


def _reference(feature_map, keypoint_xyz, voxel_offset, base_voxel_size, stride):
    """Pure-JAX reference reproducing the PyTorch module (for verification)."""
    N, C, H, W = feature_map.shape
    xy = keypoint_xyz[:, :, :2]
    off = jnp.array(voxel_offset[:2], jnp.float32)
    size = jnp.array(base_voxel_size[:2], jnp.float32) * stride
    ind = (xy - off) / size                               # (N, K, 2)
    dims = jnp.array([W - 1.0, H - 1.0], jnp.float32)
    ind = jnp.minimum(jnp.maximum(ind, 0.0), dims)
    ind = 2.0 * ind / (dims - 1.0) - 1.0
    grid = ind[:, :, ::-1]                                # flip last dim
    gx, gy = grid[..., 0], grid[..., 1]
    ix = (gx + 1.0) * 0.5 * (W - 1.0)
    iy = (gy + 1.0) * 0.5 * (H - 1.0)
    ix0f = jnp.floor(ix)
    iy0f = jnp.floor(iy)
    fx = ix - ix0f
    fy = iy - iy0f
    ix0 = ix0f.astype(jnp.int32)
    iy0 = iy0f.astype(jnp.int32)
    fm_flat = feature_map.astype(jnp.float32).reshape(N, C, H * W)

    def corner(xi, yi, wgt):
        valid = (xi >= 0) & (xi <= W - 1) & (yi >= 0) & (yi <= H - 1)
        idx = jnp.clip(yi, 0, H - 1) * W + jnp.clip(xi, 0, W - 1)
        gathered = jnp.take_along_axis(
            fm_flat, jnp.broadcast_to(idx[:, None, :], (N, C, idx.shape[-1])),
            axis=2)
        return gathered * (wgt * valid.astype(jnp.float32))[:, None, :]

    return (corner(ix0, iy0, (1.0 - fx) * (1.0 - fy))
            + corner(ix0 + 1, iy0, fx * (1.0 - fy))
            + corner(ix0, iy0 + 1, (1.0 - fx) * fy)
            + corner(ix0 + 1, iy0 + 1, fx * fy))


if __name__ == "__main__":
    # Deterministic synthetic config (no checkpoint load).
    voxel_offset = (0.0, -4.0, -3.0)       # only [:2] used
    base_voxel_size = (0.5, 0.5, 0.1)      # only [:2] used
    strides = (1, 2, 1)                    # cfg.STRIDES; last entry used
    stride = strides[-1]

    key = jax.random.PRNGKey(0)
    k_fm_a, k_kp_a, k_fm_b, k_kp_b = jax.random.split(key, 4)

    def make_inputs(kf, kk, N, C, H, W, K0):
        fm = jax.random.normal(kf, (N, C, H, W), dtype=jnp.float32)
        lo = jnp.array([voxel_offset[0], voxel_offset[1], -1.0], jnp.float32) - 0.5
        hi = jnp.array([voxel_offset[0] + W * base_voxel_size[0] * stride,
                        voxel_offset[1] + H * base_voxel_size[1] * stride,
                        1.0], jnp.float32) + 0.5
        kp = jax.random.uniform(kk, (N, K0, 3), dtype=jnp.float32,
                                minval=lo, maxval=hi)
        return fm, kp

    # A) Exact-math path: f32 compute, multi-step HW reduction (n_hw=4), split C
    #    axis (n_c=2), K not a multiple of 128 (exercises K padding + slicing).
    N, C, H, W, K0 = 2, 16, 32, 16, 100
    fm, kp = make_inputs(k_fm_a, k_kp_a, N, C, H, W, K0)
    out = jax.block_until_ready(
        bev_feature_gatherer(fm, kp, voxel_offset, base_voxel_size, stride,
                             compute_dtype=jnp.float32,
                             hw_tile_cap=128, c_tile_cap=8))
    ref = _reference(fm, kp, voxel_offset, base_voxel_size, float(stride))
    assert out.shape == (N, C, K0), out.shape
    err = float(jnp.max(jnp.abs(out - ref)))
    assert err < 1e-4, err

    # B) Production path: bf16 fm / weights, f32 MXU accumulation, f32 output.
    N, C, H, W, K0 = 2, 8, 16, 16, 128
    fm, kp = make_inputs(k_fm_b, k_kp_b, N, C, H, W, K0)
    out = jax.block_until_ready(
        bev_feature_gatherer(fm, kp, voxel_offset, base_voxel_size, stride))
    ref = _reference(fm, kp, voxel_offset, base_voxel_size, float(stride))
    assert out.shape == (N, C, K0), out.shape
    err = float(jnp.max(jnp.abs(out - ref)))
    assert err < 1e-1, err

    # C) bf16 feature map / bf16 output: exercises the f32 VMEM-scratch path.
    fm16 = fm.astype(jnp.bfloat16)
    out16 = jax.block_until_ready(
        bev_feature_gatherer(fm16, kp, voxel_offset, base_voxel_size, stride))
    ref16 = _reference(fm16, kp, voxel_offset, base_voxel_size, float(stride))
    assert out16.dtype == jnp.bfloat16
    err16 = float(jnp.max(jnp.abs(out16.astype(jnp.float32) - ref16)))
    assert err16 < 1.5e-1, err16

    print("KERNEL_OK")
</pallas_src>

<mosaic_0001>
module attributes {stable_mosaic.version = 11 : i64} {
  func.func @_bev_gather_kernel(%arg0: i32, %arg1: i32, %arg2: i32, %arg3: memref<1x2x128xf32, #tpu.memory_space<vmem>>, %arg4: memref<1x8x128xf32, #tpu.memory_space<vmem>>, %arg5: memref<1x8x128xf32, #tpu.memory_space<vmem>>) attributes {dimension_semantics = [#tpu.dimension_semantics<parallel>, #tpu.dimension_semantics<parallel>, #tpu.dimension_semantics<arbitrary>], iteration_bounds = array<i64: 2, 2, 4>, scalar_prefetch = 0 : i64, scratch_operands = 0 : i64, tpu.core_type = #tpu.core_type<tc>, window_params = [{transform_indices = @transform_0, window_bounds = array<i64: 1, 2, 128>}, {transform_indices = @transform_1, window_bounds = array<i64: 1, 8, 128>}, {transform_indices = @transform_2, window_bounds = array<i64: 1, 8, 128>}]} {
    %c0 = arith.constant 0 : index
    %c0_0 = arith.constant 0 : index
    %c0_1 = arith.constant 0 : index
    %0 = vector.load %arg3[%c0, %c0_0, %c0_1] : memref<1x2x128xf32, #tpu.memory_space<vmem>>, vector<1x2x128xf32>
    %1 = vector.shape_cast %0 : vector<1x2x128xf32> to vector<2x128xf32>
    %2 = vector.extract_strided_slice %1 {offsets = [0, 0], sizes = [1, 128], strides = [1, 1]} : vector<2x128xf32> to vector<1x128xf32>
    %3 = vector.extract_strided_slice %1 {offsets = [1, 0], sizes = [1, 128], strides = [1, 1]} : vector<2x128xf32> to vector<1x128xf32>
    %cst = arith.constant -4.000000e+00 : f32
    %4 = vector.broadcast %cst : f32 to vector<1x128xf32>
    %5 = arith.subf %3, %4 : vector<1x128xf32>
    %cst_2 = arith.constant 2.000000e+00 : f32
    %6 = vector.broadcast %cst_2 : f32 to vector<1x128xf32>
    %7 = arith.mulf %5, %6 : vector<1x128xf32>
    %cst_3 = arith.constant 0.000000e+00 : f32
    %cst_4 = arith.constant 3.100000e+01 : f32
    %8 = vector.broadcast %cst_3 : f32 to vector<1x128xf32>
    %9 = arith.maximumf %8, %7 : vector<1x128xf32>
    %10 = vector.broadcast %cst_4 : f32 to vector<1x128xf32>
    %11 = arith.minimumf %10, %9 : vector<1x128xf32>
    %cst_5 = arith.constant 5.000000e-01 : f32
    %12 = vector.broadcast %cst_5 : f32 to vector<1x128xf32>
    %13 = arith.mulf %11, %12 : vector<1x128xf32>
    %cst_6 = arith.constant 0.000000e+00 : f32
    %14 = vector.broadcast %cst_6 : f32 to vector<1x128xf32>
    %15 = arith.subf %2, %14 : vector<1x128xf32>
    %cst_7 = arith.constant 2.000000e+00 : f32
    %16 = vector.broadcast %cst_7 : f32 to vector<1x128xf32>
    %17 = arith.mulf %15, %16 : vector<1x128xf32>
    %cst_8 = arith.constant 0.000000e+00 : f32
    %cst_9 = arith.constant 1.500000e+01 : f32
    %18 = vector.broadcast %cst_8 : f32 to vector<1x128xf32>
    %19 = arith.maximumf %18, %17 : vector<1x128xf32>
    %20 = vector.broadcast %cst_9 : f32 to vector<1x128xf32>
    %21 = arith.minimumf %20, %19 : vector<1x128xf32>
    %cst_10 = arith.constant 2.21428561 : f32
    %22 = vector.broadcast %cst_10 : f32 to vector<1x128xf32>
    %23 = arith.mulf %21, %22 : vector<1x128xf32>
    %24 = tpu.iota {dimensions = array<i32: 0>} : vector<16x1xi32>
    %25 = arith.sitofp %24 : vector<16x1xi32> to vector<16x1xf32>
    %26 = vector.broadcast %25 : vector<16x1xf32> to vector<16x128xf32>
    %27 = vector.broadcast %13 : vector<1x128xf32> to vector<16x128xf32>
    %28 = arith.subf %26, %27 : vector<16x128xf32>
    %29 = math.absf %28 : vector<16x128xf32>
    %cst_11 = arith.constant 1.000000e+00 : f32
    %30 = vector.broadcast %cst_11 : f32 to vector<16x128xf32>
    %31 = arith.subf %30, %29 : vector<16x128xf32>
    %cst_12 = arith.constant 0.000000e+00 : f32
    %32 = vector.broadcast %cst_12 : f32 to vector<16x128xf32>
    %33 = arith.maximumf %32, %31 : vector<16x128xf32>
    %34 = tpu.iota {dimensions = array<i32: 0>} : vector<8x1xi32>
    %c8_i32 = arith.constant 8 : i32
    %35 = arith.muli %arg2, %c8_i32 : i32
    %36 = vector.broadcast %35 : i32 to vector<8x1xi32>
    %37 = arith.addi %34, %36 : vector<8x1xi32>
    %38 = arith.sitofp %37 : vector<8x1xi32> to vector<8x1xf32>
    %39 = vector.broadcast %38 : vector<8x1xf32> to vector<8x128xf32>
    %40 = vector.broadcast %23 : vector<1x128xf32> to vector<8x128xf32>
    %41 = arith.subf %39, %40 : vector<8x128xf32>
    %42 = math.absf %41 : vector<8x128xf32>
    %cst_13 = arith.constant 1.000000e+00 : f32
    %43 = vector.broadcast %cst_13 : f32 to vector<8x128xf32>
    %44 = arith.subf %43, %42 : vector<8x128xf32>
    %cst_14 = arith.constant 0.000000e+00 : f32
    %45 = vector.broadcast %cst_14 : f32 to vector<8x128xf32>
    %46 = arith.maximumf %45, %44 : vector<8x128xf32>
    %cst_15 = arith.constant 3.200000e+01 : f32
    %47 = vector.broadcast %cst_15 : f32 to vector<8x1xf32>
    %48 = arith.cmpf olt, %38, %47 : vector<8x1xf32>
    %cst_16 = arith.constant 0.000000e+00 : f32
    %49 = vector.shape_cast %48 : vector<8x1xi1> to vector<8x1xi1>
    %50 = vector.broadcast %49 : vector<8x1xi1> to vector<8x128xi1>
    %51 = vector.broadcast %cst_16 : f32 to vector<8x128xf32>
    %52 = arith.select %50, %46, %51 : vector<8x128xi1>, vector<8x128xf32>
    %53 = vector.shape_cast %52 : vector<8x128xf32> to vector<8x1x128xf32>
    %54 = vector.shape_cast %33 : vector<16x128xf32> to vector<1x16x128xf32>
    %55 = vector.broadcast %53 : vector<8x1x128xf32> to vector<8x16x128xf32>
    %56 = vector.broadcast %54 : vector<1x16x128xf32> to vector<8x16x128xf32>
    %57 = arith.mulf %55, %56 : vector<8x16x128xf32>
    %58 = vector.shape_cast %57 : vector<8x16x128xf32> to vector<128x128xf32>
    %c0_17 = arith.constant 0 : index
    %c0_18 = arith.constant 0 : index
    %c0_19 = arith.constant 0 : index
    %59 = vector.load %arg4[%c0_17, %c0_18, %c0_19] : memref<1x8x128xf32, #tpu.memory_space<vmem>>, vector<1x8x128xf32>
    %60 = vector.shape_cast %59 : vector<1x8x128xf32> to vector<8x128xf32>
    %cst_20 = arith.constant dense<0.000000e+00> : vector<8x128xf32>
    %61 = tpu.matmul %60, %58, %cst_20 {dimension_numbers = #tpu.dot_dimension_numbers<[1], [0], [0], [1], [0, 0, 1, 1], [], []>} : vector<8x128xf32>, vector<128x128xf32>, vector<8x128xf32> -> vector<8x128xf32>
    %c0_i32 = arith.constant 0 : i32
    %62 = arith.cmpi eq, %arg2, %c0_i32 : i32
    %63 = arith.extui %62 : i1 to i32
    %c0_i32_21 = arith.constant 0 : i32
    %64 = arith.cmpi ne, %63, %c0_i32_21 : i32
    scf.if %64 {
      %cst_28 = arith.constant 0.000000e+00 : f32
      %71 = vector.broadcast %cst_28 : f32 to vector<1x8x128xf32>
      %c0_29 = arith.constant 0 : index
      %c0_30 = arith.constant 0 : index
      %c0_31 = arith.constant 0 : index
      %72 = vector.load %arg5[%c0_29, %c0_30, %c0_31] : memref<1x8x128xf32, #tpu.memory_space<vmem>>, vector<1x8x128xf32>
      tpu.vector_store %arg5[%c0_29, %c0_30, %c0_31], %71 {strides = array<i32>} : memref<1x8x128xf32, #tpu.memory_space<vmem>>, vector<1x8x128xf32>,
    } else {
    }
    %c0_22 = arith.constant 0 : index
    %c0_23 = arith.constant 0 : index
    %c0_24 = arith.constant 0 : index
    %65 = vector.load %arg5[%c0_22, %c0_23, %c0_24] : memref<1x8x128xf32, #tpu.memory_space<vmem>>, vector<1x8x128xf32>
    %66 = vector.shape_cast %65 : vector<1x8x128xf32> to vector<8x128xf32>
    %67 = arith.addf %66, %61 : vector<8x128xf32>
    %c0_25 = arith.constant 0 : index
    %c0_26 = arith.constant 0 : index
    %c0_27 = arith.constant 0 : index
    %68 = vector.load %arg5[%c0_25, %c0_26, %c0_27] : memref<1x8x128xf32, #tpu.memory_space<vmem>>, vector<1x8x128xf32>
    %69 = vector.shape_cast %68 : vector<1x8x128xf32> to vector<8x128xf32>
    %70 = vector.shape_cast %67 : vector<8x128xf32> to vector<1x8x128xf32>
    tpu.vector_store %arg5[%c0_25, %c0_26, %c0_27], %70 {strides = array<i32>} : memref<1x8x128xf32, #tpu.memory_space<vmem>>, vector<1x8x128xf32>,
    return
  }
  func.func @transform_0(%arg0: i32, %arg1: i32, %arg2: i32) -> (i32, i32, i32) {
    %c0_i32 = arith.constant 0 : i32
    %c0_i32_0 = arith.constant 0 : i32
    %c0_i32_1 = arith.constant 0 : i32
    return %arg0, %c0_i32, %c0_i32_0 : i32, i32, i32
  }
  func.func @transform_1(%arg0: i32, %arg1: i32, %arg2: i32) -> (i32, i32, i32) {
    %c0_i32 = arith.constant 0 : i32
    return %arg0, %arg1, %arg2 : i32, i32, i32
  }
  func.func @transform_2(%arg0: i32, %arg1: i32, %arg2: i32) -> (i32, i32, i32) {
    %c0_i32 = arith.constant 0 : i32
    %c0_i32_0 = arith.constant 0 : i32
    return %arg0, %arg1, %c0_i32 : i32, i32, i32
  }
}

</mosaic_0001>

<bundles_post_ra>
// kernel: tpu_custom_call.1
= control target key start
LH: loop header
LB: loop body
LE: loop exit
PB: predicated region body
PF: predicated region fallthrough
CT: control target
= control target key end

     0   :  { %s1394_s0 = inlined_call_operand.hbm [shape: f32[2,2,128], index: 0, kind: input, shape index: {}]   ;;  %s1395_s1 = inlined_call_operand.hbm [shape: f32[2,16,512], index: 1, kind: input, shape index: {}]   ;;  %s1396_s2 = inlined_call_operand.hbm [shape: f32[2,16,128], index: 2, kind: output, shape index: {}]  }
   0x1   :  { %1415 = sst [smem:[#allocation24_spill]] %s1394_s0 }
   0x2   :  { %1416 = sst [smem:[#allocation25_spill]] %s1396_s2 }
   0x3   :  { %7 = vsyncpa [#allocation3], 0 }
   0x4   :  { %9 = vsyncpa [#allocation3 + $0x1], 0 }
   0x5   :  { %10 = vsyncpa [#allocation6], 0 }
   0x6   :  { %12 = vsyncpa [#allocation6 + $0x1], 0 }
   0x7   :  { %13 = vsyncpa [#allocation4], 0 }
   0x8   :  { %15 = vsyncpa [#allocation4 + $0x1], 0  ;;  %s1054_s9 = smov 0   ;;  %s1056_s10 = smov 0  }
   0x9   :  { %s1058_s11 = smov 0   ;;  %s1060_s12 = smov 0  }
   0xa   :  { %s1062_s13 = smov 0   ;;  %s1064_s14 = smov 0  }
   0xb   :  { %s1066_s15 = smov 0   ;;  %s1068_s16 = smov 0  }
   0xc   :  { %s1070_s17 = smov 0   ;;  %s1072_s18 = smov 0  }
   0xd   :  { %s1074_s19 = smov 0   ;;  %s1076_s20 = smov 0  }
   0xe   :  { %s1078_s21 = smov 0   ;;  %s1080_s22 = smov 0  }
   0xf   :  { %s1082_s23 = smov 0   ;;  %s1084_s24 = smov 0  }
  0x10 LB: > { %1417 = sst [smem:[#allocation11_spill]] %s970_s9  ;;  %s585_s25 = sadd.s32 4294967295, %s1030_s24   ;;  %s1030_s24 = sphi %s1084_s24, %s21_s24   ;;  %s1026_s23 = sphi %s1082_s23, %s1477_s23   ;;  %s1022_s22 = sphi %s1080_s22, %s1476_s22   ;;  %s1018_s21 = sphi %s1078_s21, %s1475_s21   ;;  %s1014_s20 = sphi %s1076_s20, %s1474_s20   ;;  %s1010_s19 = sphi %s1074_s19, %s1473_s19   ;;  %s1006_s18 = sphi %s1072_s18, %s1472_s18   ;;  %s1002_s17 = sphi %s1070_s17, %s1471_s17   ;;  %s998_s16 = sphi %s1068_s16, %s1470_s16   ;;  %s994_s15 = sphi %s1066_s15, %s1469_s15   ;;  %s990_s14 = sphi %s1064_s14, %s1468_s14   ;;  %s986_s13 = sphi %s1062_s13, %s1467_s13   ;;  %s982_s12 = sphi %s1060_s12, %s1461_s12   ;;  %s978_s11 = sphi %s1058_s11, %s1466_s11   ;;  %s974_s10 = sphi %s1056_s10, %s1465_s10   ;;  %s970_s9 = sphi %s1054_s9, %s1460_s9  }
  0x11   : > { %1418 = sst [smem:[#allocation12_spill]] %s974_s10  ;;  %p54_p0 = scmp.ne.s32.totalorder %s1002_s17, %s998_s16 }
  0x12   : > { %1419 = sst [smem:[#allocation13_spill]] %s986_s13  ;;  %p1399_p1 = scmp.eq.s32.totalorder %s1030_s24, 0 }
  0x13   : > { %1420 = sst [smem:[#allocation14_spill]] %s1006_s18  ;;  %p60_p2 = scmp.ne.s32.totalorder %s998_s16, %s994_s15 }
  0x14   : > { %1421 = sst [smem:[#allocation15_spill]] %s1010_s19  ;;  %p1139_p3 = scmp.eq.s32.totalorder %s585_s25, 0 }
  0x15   : > { %1422 = sst [smem:[#allocation16_spill]] %s1014_s20  ;;  %p1143_p4 = scmp.eq.s32.totalorder %s585_s25, 15 }
  0x16   : > { %p56_p5 = por %p1399_p1, %p54_p0  ;;  %p1151_p6 = por %p1139_p3, %p60_p2 }
  0x17   : > { %p1398_p7 = scmp.lt.s32.totalorder %s1030_s24, 16  ;;  %s142_s3 = sand.u32 1, %s1002_s17  }
  0x18   : > { %s1425_s30 = scalar_select %p1151_p6, 1, 0 }
  0x19   : > { %s590_s4 = sshll.u32 %s1026_s23, 5  ;;  %s589_s5 = sshll.u32 %s142_s3, 1 }
  0x1a   : > { %1426 = sst [smem:[#allocation17_spill]] %s1425_s30  ;;  %s146_s15 = scalar_lea.vmem [#allocation2], %s589_s5 }
  0x1b   : > { %s1427_s0 = sld [smem:[#allocation24_spill]]  ;;  %s153_s25 = sshll.u32 %s146_s15, 4  ;;  %s154_s25 = int_to_ptr.vmem [resolvable:$true] %s153_s25 }
  0x1c   : > { %p1163_p8 = pnand %p1398_p7, %p56_p5  ;;  %p595_p9 = scmp.ge.s32.totalorder %s1030_s24, 1 }
  0x1d   : > { %p180_p10 = scmp.lt.s32.totalorder %s1030_s24, 17  ;;  %s143_s26 = scalar_lea.sflag [#allocation3], %s142_s3 }
  0x1e   : > { %p812_p11 = pneg %p1163_p8  ;;  %s823_s2 = scalar_lea.vmem %s154_s25, 32 }
  0x1f   : > { %p824_p12 = scmp.ne.s32.totalorder %s154_s25, %s823_s2  ;;  %s1032_s6 = smov [#allocation2]  }
  0x21   : > { %s151_s8 = scalar_lea.hbm %s1427_s0, %s590_s4  ;;  %p826_p13 = pnand %p824_p12, %p812_p11 }
  0x22   : > { %s828_s4 = sshll.u32 %s1032_s6, 4  ;;  %s829_s4 = int_to_ptr.vmem [resolvable:$false] %s828_s4 }
  0x23   : > { %p827_p0 = pneg %p826_p13  ;;  %s830_s5 = scalar_lea.vmem %s829_s4, 64 }
  0x24   : > { %p831_p2 = scmp.lt.s32.totalorder %s154_s25, %s829_s4  ;;  %p832_p5 = scmp.lt.s32.totalorder %s830_s5, %s823_s2 }
  0x26   : > { %p833_p7 = por %p832_p5, %p831_p2 }
  0x28   : > { %p834_p1 = pnand %p833_p7, %p827_p0 }
  0x2a   : > { %837 = shalt.err (!%p834_p1)
}
  0x2b   : > { %668 = dma.hbm_to_vmem [thread:$0]  (!%p1163_p8), %s151_s8, 32, %s154_s25, %s143_s26  }
  0x2c   : > { %p1177_p1 = pnand %p595_p9, %p180_p10  ;;  %s586_s27 = sadd.s32 4294967294, %s1030_s24  }
  0x2d   : > { %s33_s3 = sadd.s32 1, %s1018_s21  ;;  %s36_s7 = sadd.s32 1, %s1022_s22 }
  0x2e   : > { %p34_p7 = scmp.ge.s32.totalorder %s33_s3, 4  ;;  %p84_p8 = scmp.ne.s32.totalorder %s990_s14, %s986_s13 }
  0x2f   : > { %p90_p11 = scmp.ne.s32.totalorder %s986_s13, %s982_s12  ;;  %p1431_p9 = scmp.eq.s32.totalorder %s1030_s24, 0 }
  0x30   : > { %s1479_s3 = smov (%p34_p7, %s33_s3), 0  ;;  %s1481_s7 = smov (!%p34_p7, %s36_s7), %s1022_s22 }
  0x31   : > { %1430 = sst [smem:[#allocation18_spill]] %s1479_s3  ;;  %s73_s26 = ssub.s32 %s1018_s21, %s1479_s3 }
  0x32   : > { %p1196_p10 = por %p84_p8, %p1431_p9  ;;  %p38_p12 = scmp.ge.s32.totalorder %s1481_s7, 2 }
  0x33   : > { %p1202_p13 = por %p90_p11, %p1139_p3  ;;  %s105_s6 = sadd.s32 1, %s978_s11 }
  0x34   : > { %p115_p0 = scmp.ne.s32.totalorder %s978_s11, %s974_s10  ;;  %s1483_s7 = smov (%p38_p12, %s1481_s7), 0 }
  0x35   : > { %s1433_s25 = scalar_select %p1202_p13, 1, 0 }
  0x36   : > { %1435 = sst [smem:[#allocation20_spill]] %s1483_s7  ;;  %s1436_s12 = sadd.s32 1, %s1026_s23 }
  0x37   : > { %1434 = sst [smem:[#allocation19_spill]] %s1433_s25  ;;  %s1485_s12 = smov (!%p38_p12, %s1436_s12), %s1026_s23 }
  0x38   : > { %s71_s4 = ssub.s32 %s1022_s22, %s1483_s7  ;;  %p1218_p2 = por %p1143_p4, %p115_p0 }
  0x39   : > { %p42_p3 = scmp.ge.s32.totalorder %s1485_s12, 2  ;;  %p121_p5 = scmp.ne.s32.totalorder %s974_s10, %s970_s9 }
  0x3a   : > { %s1437_s5 = scalar_select %p1218_p2, 1, 0 }
  0x3b   : > { %p122_p7 = scmp.eq.s32.totalorder %s586_s27, 15  ;;  %s160_s28 = sand.u32 1, %s990_s14  }
  0x3c   : > { %1438 = sst [smem:[#allocation21_spill]] %s1437_s5  ;;  %s1487_s12 = smov (%p42_p3, %s1485_s12), 0 }
  0x3d   : > { %1439 = sst [smem:[#allocation22_spill]] %s1487_s12  ;;  %p1227_p8 = por %p122_p7, %p121_p5 }
  0x3e   : > { %s44_s29 = ssub.s32 %s1026_s23, %s1487_s12  ;;  %s591_s0 = sshll.u32 %s160_s28, 3 }
  0x3f   : > { %s1440_s15 = scalar_select %p1227_p8, 1, 0 }
  0x40   : > { %p45_p4 = scmp.eq.s32.totalorder %s44_s29, 0  ;;  %s72_s7 = sor.u32 %s71_s4, %s44_s29 }
  0x41   : > { %1441 = sst [smem:[#allocation23_spill]] %s1440_s15  ;;  %s74_s3 = sor.u32 %s73_s26, %s72_s7 }
  0x42   : > { %p103_p11 = scmp.eq.s32.totalorder %s72_s7, 0  ;;  %s1442_s9 = sadd.s32 1, %s1002_s17 }
  0x43   : > { %s1236_s5 = scalar_select %p45_p4, %s1002_s17, %s1442_s9  }
  0x44   : > { %p75_p9 = scmp.eq.s32.totalorder %s74_s3, 0  ;;  %s1443_s19 = sadd.s32 1, %s990_s14 }
  0x45   : > { %s1239_s27 = scalar_select %p103_p11, %s978_s11, %s105_s6  }
  0x46   : > { %s1244_s20 = scalar_select %p75_p9, %s990_s14, %s1443_s19  }
  0x47   : > { %s592_s18 = sshll.u32 %s1022_s22, 2  ;;  %s593_s10 = sshll.u32 %s1026_s23, 3 }
  0x48   : > { %s169_s15 = sadd.s32 %s1018_s21, %s592_s18  ;;  %s164_s12 = scalar_lea.vmem [#allocation5], %s591_s0 }
  0x49   : > { %s175_s25 = sshll.u32 %s164_s12, 4  ;;  %s171_s13 = sadd.s32 %s593_s10, %s169_s15  ;;  %s176_s25 = int_to_ptr.vmem [resolvable:$true] %s175_s25 }
  0x4a   : > { %s594_s30 = sshll.u32 %s171_s13, 7  ;;  %p1444_p12 = scmp.lt.s32.totalorder %s1030_s24, 16 }
  0x4b   : > { %s173_s19 = scalar_lea.hbm %s1395_s1, %s594_s30  ;;  %s161_s26 = scalar_lea.sflag [#allocation6], %s160_s28 }
  0x4c   : > { %p1253_p0 = pnand %p1444_p12, %p1196_p10  ;;  %s851_s18 = scalar_lea.vmem %s176_s25, 128 }
  0x4d   : > { %p852_p5 = scmp.ne.s32.totalorder %s176_s25, %s851_s18  ;;  %s1033_s0 = smov [#allocation5]  }
  0x4e   : > { %p840_p3 = pneg %p1253_p0  ;;  %s856_s10 = sshll.u32 %s1033_s0, 4  ;;  %s857_s10 = int_to_ptr.vmem [resolvable:$false] %s856_s10 }
  0x4f   : > { %s858_s13 = scalar_lea.vmem %s857_s10, 256  ;;  %p859_p10 = scmp.lt.s32.totalorder %s176_s25, %s857_s10 }
  0x50   : > { %p854_p7 = pnand %p852_p5, %p840_p3  ;;  %p860_p11 = scmp.lt.s32.totalorder %s858_s13, %s851_s18 }
  0x52   : > { %p855_p4 = pneg %p854_p7  ;;  %p861_p9 = por %p860_p11, %p859_p10 }
  0x54   : > { %p862_p12 = pnand %p861_p9, %p855_p4 }
  0x56   : > { %865 = shalt.err (!%p862_p12)
}
  0x57   : > { %671 = dma.hbm_to_vmem [thread:$0]  (!%p1253_p0), %s173_s19, 128, %s176_s25, %s161_s26  }
  0x58   : > { %184 = sbr.rel (%p1177_p1) target bundleno = 395 (0x18b), region = 28  ;;  %s186_s15 = sand.u32 (!%p1177_p1), 1, %s998_s16  }
  0x59   : > { %s596_s8 = sshll.u32 (!%p1177_p1), %s186_s15, 1  ;;  %s187_s6 = scalar_lea.sflag (!%p1177_p1), [#allocation3], %s186_s15 }
  0x5a   : > { %s190_s12 = scalar_lea.vmem (!%p1177_p1), [#allocation2], %s596_s8 }
  0x5d   : > { %957 = dma.done.wait (%p1151_p6), %s187_s6, 32  }
  0x5e   : > { %959 = vsyncadd (%p1151_p6), %s187_s6, 4294967264  ;;  %s1447_s4 = sld [smem:[#allocation13_spill]] }
  0x64   : > { %s195_s29 = sand.u32 1, %s1447_s4  }
  0x65   : > { %s1272_s9 = sshll.u32 %s195_s29, 3  ;;  %s196_s25 = scalar_lea.sflag [#allocation6], %s195_s29 }
  0x66   : > { %s199_s2 = scalar_lea.vmem [#allocation5], %s1272_s9 }
  0x67   : > { %961 = dma.done.wait (%p1202_p13), %s196_s25, 128  }
  0x68   : > { %963 = vsyncadd (%p1202_p13), %s196_s25, 4294967168  ;;  %s1449_s7 = sld [smem:[#allocation12_spill]]  ;;  %v1034_v0 = vmov 0.0   ;;  %v235_v1 = vlaneseq  ;;  %vm1035_vm0 = vmmov 0   ;;  %v225_v3 = vld [vmem:[%s190_s12] sm:$0x3] }
  0x69   : > { %s1450_s3 = sld [smem:[#allocation14_spill]]  ;;  %624 = vmatprep.subr.mxu0 %v1034_v0  ;;  %656 = vmatprep.mubr.msk.f32.mxu0 %vm1035_vm0, %v1034_v0  ;;  %v599_v5 = vadd.f32 4.0, %v225_v3  ;;  %v231_v6 = vmul.f32 2.0, %v225_v3  ;;  %v1036_v20 = vmov 1966171168  }
  0x6a   : > { %v236_v2 = vshrl.u32 %v235_v1, 7  ;;  %v271_v21 = vunpack.c.l.s4 %v1036_v20 }
  0x6b   : > { %v227_v7 = vmul.f32 2.0, %v599_v5  ;;  %v232_v8 = vmax.f32 %v231_v6, 0.0 }
  0x6c   : > { %v1287_v12 = vsub.s32 0, %v236_v2  ;;  %v237_v16 = vadd.s32 8, %v236_v2  ;;  %v242_v17 = vsub.s32 1, %v236_v2  ;;  %v238_v23 = vcvt.s32.f32 %v236_v2 }
  0x6d   : > { %v228_v10 = vmax.f32 %v227_v7, 0.0  ;;  %v233_v11 = vmin.f32 %v232_v8, 15.0  ;;  %v272_v27 = vunpack.c.0.s8 %v271_v21 }
  0x6e   : > { %s222_s19 = sand.u32 1, %s1449_s7   ;;  %v239_v24 = vcvt.s32.f32 %v237_v16 }
  0x6f   : > { %s1282_s26 = sshll.u32 %s222_s19, 3  ;;  %s600_s18 = sshll.u32 %s1450_s3, 3  ;;  %v229_v13 = vmin.f32 %v228_v10, 31.0  ;;  %v234_v14 = vmul.f32 2.2142856, %v233_v11  ;;  %v275_v32 = vsub.s32 %v272_v27, %v236_v2 }
  0x70   : > { %v253_v4 = vstv %s600_s18  ;;  %s224_s0 = scalar_lea.vmem [#allocation7], %s1282_s26  ;;  %p601_p6 = scmp.ne.s32.totalorder %s1450_s3, 0 }
  0x71   : > { %v254_v9 = vadd.s32 %v253_v4, %v236_v2  ;;  %v230_v18 = vmul.f32 0.5, %v229_v13  ;;  %v259_v19 = vrot.slane %v234_v14, %v1287_v12 }
  0x73   : > { %v255_v15 = vcvt.s32.f32 %v254_v9  ;;  %v243_v25 = vrot.slane %v230_v18, %v242_v17 }
  0x75   : > { %v260_v22 = vsub.f32 %v255_v15, %v259_v19  ;;  %v244_v29 = vsub.f32 %v238_v23, %v243_v25  ;;  %v245_v30 = vsub.f32 %v239_v24, %v243_v25  ;;  %vm264_vm1 = vcmp.lt.f32.partialorder %v255_v15, 32.0  ;;  %v374_v15 = vld [vmem:[%s199_s2] sm:$0xff] }
  0x77   : > { %v261_v26 = vand.u32 2147483647, %v260_v22  ;;  %v246_v34 = vand.u32 2147483647, %v244_v29  ;;  %v247_v35 = vand.u32 2147483647, %v245_v30 }
  0x79   : > { %v262_v28 = vsub.f32 1.0, %v261_v26  ;;  %v248_v38 = vsub.f32 1.0, %v246_v34  ;;  %v249_v39 = vsub.f32 1.0, %v247_v35 }
  0x7b   : > { %v263_v31 = vmax.f32 %v262_v28, 0.0  ;;  %v250_v45 = vmax.f32 %v248_v38, 0.0  ;;  %v251_v46 = vmax.f32 %v249_v39, 0.0 }
  0x7d   : > { %v267_v33 = vsel %vm264_vm1, %v263_v31, 0.0 }
  0x7e   : > { %v269_v36 = vcombine.high %v267_v33, %v267_v33  ;;  %v276_v44 = vrot.slane %v267_v33, %v275_v32 }
  0x80   : > { %v283_v37 = vrot.slane %v269_v36, %v275_v32  ;;  %v284_v50 = vcombine.high %v276_v44, %v276_v44  ;;  %v292_v60 = vrot.slane %v276_v44, %v275_v32 }
  0x82   : > { %v285_v40 = vcombine.high %v283_v37, %v283_v37  ;;  %v299_v41 = vrot.slane %v283_v37, %v275_v32  ;;  %v306_v55 = vrot.slane %v284_v50, %v275_v32  ;;  %v314_v1 = vcombine.high %v292_v60, %v292_v60 }
  0x83   : > { %v321_v10 = vrot.slane %v292_v60, %v1287_v12 }
  0x84   : > { %v313_v42 = vrot.slane %v285_v40, %v275_v32  ;;  %v315_v43 = vcombine.high %v299_v41, %v299_v41  ;;  %v337_v58 = vrot.slane %v299_v41, %v1287_v12  ;;  %v316_v59 = vcombine.high %v306_v55, %v306_v55 }
  0x85   : > { %v329_v4 = vrot.slane %v314_v1, %v1287_v12  ;;  %v325_v7 = vrot.slane %v306_v55, %v1287_v12  ;;  %v359_v13 = vmul.f32 %v321_v10, %v251_v46  ;;  %v358_v14 = vmul.f32 %v321_v10, %v250_v45 }
  0x86   : > { %v317_v47 = vcombine.high %v313_v42, %v313_v42  ;;  %v345_v49 = vrot.slane %v315_v43, %v1287_v12  ;;  %v341_v54 = vrot.slane %v313_v42, %v1287_v12  ;;  %v367_v62 = vmul.f32 %v337_v58, %v251_v46 }
  0x87   : > { %v333_v63 = vrot.slane %v316_v59, %v1287_v12  ;;  %v366_v2 = vmul.f32 %v337_v58, %v250_v45  ;;  %v363_v6 = vmul.f32 %v329_v4, %v251_v46  ;;  %v362_v8 = vmul.f32 %v329_v4, %v250_v45 }
  0x88   : > { %v349_v48 = vrot.slane %v317_v47, %v1287_v12  ;;  %v371_v53 = vmul.f32 %v345_v49, %v251_v46  ;;  %v370_v56 = vmul.f32 %v345_v49, %v250_v45  ;;  %v369_v57 = vmul.f32 %v341_v54, %v251_v46 }
  0x89   : > { %v368_v61 = vmul.f32 %v341_v54, %v250_v45  ;;  %v365_v3 = vmul.f32 %v333_v63, %v251_v46  ;;  %v364_v5 = vmul.f32 %v333_v63, %v250_v45  ;;  %v361_v9 = vmul.f32 %v325_v7, %v251_v46 }
  0x8a   : > { %v373_v51 = vmul.f32 %v349_v48, %v251_v46  ;;  %v372_v52 = vmul.f32 %v349_v48, %v250_v45  ;;  %v360_v11 = vmul.f32 %v325_v7, %v250_v45 }
  0x8c   : > { %625 = vmatpush3.msra.mxu0 %v373_v51 }
  0x8d   : > { %626 = vmatprep.subr.mxu0 %v1034_v0 }
  0x8e   : > { %627 = vmatpush3.msra.mxu0 %v372_v52 }
  0x8f   : > { %628 = vmatprep.subr.mxu0 %v1034_v0 }
  0x90   : > { %629 = vmatpush3.msra.mxu0 %v371_v53 }
  0x91   : > { %630 = vmatprep.subr.mxu0 %v1034_v0 }
  0x92   : > { %631 = vmatpush3.msra.mxu0 %v370_v56 }
  0x93   : > { %632 = vmatprep.subr.mxu0 %v1034_v0 }
  0x94   : > { %633 = vmatpush3.msra.mxu0 %v369_v57 }
  0x95   : > { %634 = vmatprep.subr.mxu0 %v1034_v0 }
  0x96   : > { %635 = vmatpush3.msra.mxu0 %v368_v61 }
  0x97   : > { %636 = vmatprep.subr.mxu0 %v1034_v0 }
  0x98   : > { %637 = vmatpush3.msra.mxu0 %v367_v62 }
  0x99   : > { %638 = vmatprep.subr.mxu0 %v1034_v0 }
  0x9a   : > { %639 = vmatpush3.msra.mxu0 %v366_v2 }
  0x9b   : > { %640 = vmatprep.subr.mxu0 %v1034_v0 }
  0x9c   : > { %641 = vmatpush3.msra.mxu0 %v365_v3 }
  0x9d   : > { %642 = vmatprep.subr.mxu0 %v1034_v0 }
  0x9e   : > { %643 = vmatpush3.msra.mxu0 %v364_v5 }
  0x9f   : > { %644 = vmatprep.subr.mxu0 %v1034_v0 }
  0xa0   : > { %645 = vmatpush3.msra.mxu0 %v363_v6 }
  0xa1   : > { %646 = vmatprep.subr.mxu0 %v1034_v0 }
  0xa2   : > { %647 = vmatpush3.msra.mxu0 %v362_v8 }
  0xa3   : > { %648 = vmatprep.subr.mxu0 %v1034_v0 }
  0xa4   : > { %649 = vmatpush3.msra.mxu0 %v361_v9 }
  0xa5   : > { %650 = vmatprep.subr.mxu0 %v1034_v0 }
  0xa6   : > { %651 = vmatpush3.msra.mxu0 %v360_v11 }
  0xa7   : > { %652 = vmatprep.subr.mxu0 %v1034_v0 }
  0xa8   : > { %653 = vmatpush3.msra.mxu0 %v359_v13 }
  0xa9   : > { %654 = vmatprep.subr.mxu0 %v1034_v0 }
  0xaa   : > { %655 = vmatpush3.msra.mxu0 %v358_v14 }
  0xab   : > { %657 = vmatmul.mubr.f32.vlgmr.msra.gmra.mxu0 %v374_v15 }
 0x169   : > { %448 = sbr.rel (%p601_p6) target bundleno = 368 (0x170), region = 40 }
 0x16b   : > { %v441_v12 = vpop.f32.mrf.mxu0 }
 0x16d   : > { %v658_v16 = vpop.f32.mrf.mxu0 }
 0x16e   : > { %v1037_v17 = vmov 0.0  }
 0x16f   : > { %449 = vst [vmem:[%s224_s0] sm:$0xff] %v1037_v17 }
 0x170 PF: > { %s1451_s10 = sld [smem:[#allocation16_spill]]  ;;  %s469_s12 = sshll.u32 %s224_s0, 4  ;;  %s470_s12 = int_to_ptr.vmem [resolvable:$true] %s469_s12 }
 0x171   : > { %s1452_s13 = sld [smem:[#allocation15_spill]]  ;;  %s454_s7 = scalar_lea.sflag [#allocation4], %s222_s19 }
 0x172   : > { %s1455_s9 = sld [smem:[#allocation25_spill]]  ;;  %s866_s3 = scalar_lea.vmem %s470_s12, 128 }
 0x173   : > { %p867_p1 = scmp.ne.s32.totalorder %s470_s12, %s866_s3  ;;  %s1038_s26 = smov [#allocation7]  }
 0x174   : > { %s870_s18 = sshll.u32 %s1038_s26, 4  ;;  %s871_s18 = int_to_ptr.vmem [resolvable:$false] %s870_s18 }
 0x175   : > { %p868_p13 = pnand %p867_p1, %p1218_p2  ;;  %p873_p3 = scmp.lt.s32.totalorder %s470_s12, %s871_s18 }
 0x176   : > { %v450_v18 = vld [vmem:[%s224_s0] sm:$0xff]  ;;  %s603_s8 = sshll.u32 %s1451_s10, 1  ;;  %s872_s10 = scalar_lea.vmem %s871_s18, 256 }
 0x177   : > { %v451_v19 = vadd.f32 %v450_v18, %v441_v12  ;;  %s465_s6 = sadd.s32 %s1452_s13, %s603_s8  ;;  %p869_p0 = pneg %p868_p13 }
 0x178   : > { %s604_s4 = sshll.u32 %s465_s6, 7  ;;  %s1456_s25 = smov %s1455_s9 }
 0x179   : > { %452 = vst [vmem:[%s224_s0] sm:$0xff] %v451_v19  ;;  %s467_s2 = scalar_lea.hbm %s1455_s9, %s604_s4  ;;  %p874_p5 = scmp.lt.s32.totalorder %s872_s10, %s866_s3 }
 0x17b   : > { %p875_p7 = por %p874_p5, %p873_p3 }
 0x17d   : > { %p876_p4 = pnand %p875_p7, %p869_p0 }
 0x17f   : > { %879 = shalt.err (!%p876_p4)
}
 0x180   : > { %s880_s0 = scalar_lea.hbm %s467_s2, 128  ;;  %s884_s30 = scalar_lea.hbm %s1456_s25, 512 }
 0x181   : > { %p881_p10 = scmp.ne.s32.totalorder %s467_s2, %s880_s0  ;;  %p885_p12 = scmp.lt.s32.totalorder %s467_s2, %s1456_s25 }
 0x182   : > { %p886_p6 = scmp.lt.s32.totalorder %s884_s30, %s880_s0 }
 0x183   : > { %p882_p11 = pnand %p881_p10, %p1218_p2 }
 0x184   : > { %p887_p1 = por %p886_p6, %p885_p12 }
 0x185   : > { %p883_p9 = pneg %p882_p11 }
 0x187   : > { %p888_p13 = pnand %p887_p1, %p883_p9 }
 0x189   : > { %891 = shalt.err (!%p888_p13)
}
 0x18a   : > { %663 = dma.vmem_to_hbm [thread:$0]  (%p1218_p2), %s470_s12, 128, %s467_s2, %s454_s7  }
 0x18b PF: > { %s1457_s4 = sld [smem:[#allocation11_spill]]  ;;  %p677_p0 = scmp.ge.s32.totalorder %s1030_s24, 2 }
 0x18d   : > { %p673_p3 = pnand %p677_p0, %p1227_p8 }
 0x18f   : > { %p674_p5 = pneg %p673_p3 }
 0x191   : > { %s481_s29 = sand.u32 1, %s1457_s4  }
 0x192   : > { %s482_s9 = scalar_lea.sflag [#allocation4], %s481_s29 }
 0x193   : > { %965 = dma.done.wait (%p674_p5), %s482_s9, 128  }
 0x194   : > { %967 = vsyncadd (%p674_p5), %s482_s9, 4294967168  ;;  %s21_s24 = sadd.s32 1, %s1030_s24   ;;  %s1460_s9 = sld [smem:[#allocation12_spill]] }
 0x195   : > { %p1341_p7 = scmp.ge.s32.totalorder %s21_s24, 18   ;;  %s1461_s12 = sld [smem:[#allocation13_spill]] }
 0x196   : > { %s1462_s2 = sld [smem:[#allocation18_spill]]  ;;  %s1465_s10 = smov %s978_s11 }
 0x197   : > { %s1463_s7 = sld [smem:[#allocation20_spill]]  ;;  %s1466_s11 = smov %s1239_s27 }
 0x198   : > { %s1464_s26 = sld [smem:[#allocation22_spill]]  ;;  %s1467_s13 = smov %s990_s14 }
 0x199   : > { %s1468_s14 = smov %s1244_s20  ;;  %s1469_s15 = smov %s998_s16 }
 0x19a   : > { %s1470_s16 = smov %s1002_s17  ;;  %s1471_s17 = smov %s1236_s5 }
 0x19b   : > { %s1472_s18 = smov %s1018_s21  ;;  %s1473_s19 = smov %s1022_s22 }
 0x19c   : > { %s1474_s20 = smov %s1026_s23  ;;  %s1475_s21 = smov %s1462_s2 }
 0x19d   : > { %s1476_s22 = smov %s1463_s7  ;;  %20 = sbr.rel (!%p1341_p7) target bundleno = 16 (0x10), region = 90 }
 0x19e   : > { %s1477_s23 = smov %s1464_s26 }
 0x1a2   :  { %487 = vsyncpa [#allocation3], 1 }
 0x1a3   :  { %489 = vsyncpa [#allocation3 + $0x1], 1 }
 0x1a4   :  { %490 = vsyncpa [#allocation6], 1 }
 0x1a5   :  { %492 = vsyncpa [#allocation6 + $0x1], 1 }
 0x1a6   :  { %493 = vsyncpa [#allocation4], 1 }
 0x1a7   :  { %495 = vsyncpa [#allocation4 + $0x1], 1 }

</bundles_post_ra>
